<compile_context>
chip_gen: v7x
topology: tpu7x:2x2x1
jax: 0.10.0
libtpu: 0.0.40
codegen_flags: <defaults>
</compile_context>

<pallas_src>
import functools

import jax
import jax.numpy as jnp
from jax.experimental import pallas as pl
from jax.experimental.pallas import tpu as pltpu


# ---------------------------------------------------------------------------
# Kernel
# ---------------------------------------------------------------------------
def _aspp_kernel(xc_ref, xn_ref, wmain_ref, wca_ref, wcb_ref, mask_ref,
                 b13_ref, beff_ref, o_ref, *, W, dil, cout, th):
    """One (batch, row-block) step; everything in (channels, TH*W) layout.

    xc_ref : (1, Cin, TH*W)  bf16  current row block of the padded image
    xn_ref : (1, Cin, TH*W)  bf16  next row block (first 2*dil rows = halo)
    wmain  : (10*Cout, Cin)  bf16  rows = [w1 | 3x3 tap(0,0)..tap(2,2)]
    wca/b  : (Cout, Cout)    bf16  conv_cat weights for c1 / c3
    mask   : (2, TH*W)       f32   [left-valid, right-valid] column masks
    b13    : (Cout, 2)       f32   [b1 | b3] biases (BN folded)
    beff   : (1, Cout, 1)    f32   conv_cat bias + folded global branch
    o_ref  : (1, Cout, TH*W) f32
    """
    thw = th * W
    halo = 2 * dil * W
    dw = dil * W

    xc = xc_ref[0]                                            # (Cin, THW)
    xn = xn_ref[0]
    x_ext = jnp.concatenate([xc, xn[:, :halo]], axis=1)       # (Cin, THW+HALO)

    # One stacked MXU pass: branch1 rows + the 9 dilated-conv taps.
    y = jnp.dot(wmain_ref[...], x_ext,
                preferred_element_type=jnp.float32)           # (10*Cout, Lext)

    # ---- branch1: 1x1 conv + BN + ReLU (center rows of the halo window) ----
    c1 = jnp.maximum(y[0:cout, dw:dw + thw] + b13_ref[:, 0:1], 0.0)

    # ---- branch2: 3x3 dilated conv; taps = static lane slices of y -------
    def tap(t):
        kh, kw = t // 3, t % 3
        rows = y[cout * (1 + t):cout * (2 + t), :]            # 8-aligned rows
        off = kh * dw + (kw - 1) * dil                        # lane offset
        if off < 0:                 # tap (0,0): clamp to 0, roll right by dil
            return pltpu.roll(rows[:, 0:thw], shift=dil, axis=1)
        if off > halo:              # tap (2,2): clamp to halo, roll left
            return pltpu.roll(rows[:, halo:halo + thw], shift=thw - dil, axis=1)
        return rows[:, off:off + thw]
    # Lanes wrapped by the two corner rolls land only on masked border columns.

    left = tap(0) + tap(3) + tap(6)                           # kw == 0 group
    mid = tap(1) + tap(4) + tap(7)                            # kw == 1 group
    right = tap(2) + tap(5) + tap(8)                          # kw == 2 group
    acc = left * mask_ref[0:1, :] + mid + right * mask_ref[1:2, :]
    c3 = jnp.maximum(acc + b13_ref[:, 1:2], 0.0)

    # ---- conv_cat: two accumulated dots; global branch folded into beff ----
    out = (jnp.dot(wca_ref[...], c1.astype(jnp.bfloat16),
                   preferred_element_type=jnp.float32)
           + jnp.dot(wcb_ref[...], c3.astype(jnp.bfloat16),
                     preferred_element_type=jnp.float32)
           + beff_ref[0])
    o_ref[0] = jnp.maximum(out, 0.0)                          # lane-dense store


# ---------------------------------------------------------------------------
# Wrapper
# ---------------------------------------------------------------------------
def _pick_row_block(H, W, dil, max_lanes=2048):
    cands = [t for t in range(1, H + 1)
             if H % t == 0 and t >= 2 * dil and (t * W) % 128 == 0]
    if not cands:
        return H
    small = [t for t in cands if t * W <= max_lanes]
    return max(small) if small else min(cands)


def aspp_pallas(x_nchw, params, *, dil, row_block=None):
    """x_nchw: (B, Cin, H, W) float32.  Returns (B, Cout, H, W) float32."""
    B, Cin, H, W = x_nchw.shape
    w1, b1, w3, b3, w5, b5, wcat, bcat = params
    Cout = w1.shape[0]

    TH = row_block if row_block is not None else _pick_row_block(H, W, dil)
    assert H % TH == 0, "row_block must divide H"
    assert TH >= 2 * dil, "row_block must cover the dilation halo"
    assert (TH * W) % 128 == 0, "keep row blocks lane-dense (multiple of 128)"
    R = H // TH
    THW = TH * W
    Hpp = (R + 1) * TH                       # padded height, multiple of TH

    # ---- pack weights (BN already folded); bf16 for the MXU passes --------
    taps = jnp.transpose(w3, (2, 3, 0, 1)).reshape(9 * Cout, Cin)
    wmain = jnp.concatenate([w1, taps], axis=0).astype(jnp.bfloat16)
    wc_a = wcat[:, :Cout].astype(jnp.bfloat16)
    wc_b = wcat[:, Cout:2 * Cout].astype(jnp.bfloat16)
    wc_g = wcat[:, 2 * Cout:]
    b13 = jnp.stack([b1, b3], axis=1)                          # (Cout, 2) f32

    # ---- hoisted branch5: global pool -> 1x1 conv -> ReLU, folded (with the
    # align_corners bilinear upsample of a 1x1 map == broadcast) into the
    # conv_cat bias -----------------------------------------------------------
    hp = jax.lax.Precision.HIGHEST
    g = jnp.mean(x_nchw, axis=(2, 3))                          # (B, Cin)
    g = jax.nn.relu(jnp.einsum('bc,oc->bo', g, w5, precision=hp) + b5)
    bias_eff = (bcat[None, :]
                + jnp.einsum('bo,po->bp', g, wc_g, precision=hp))[..., None]

    # ---- vertically zero-padded input, flattened, bf16 --------------------
    x_pad = jnp.pad(x_nchw, ((0, 0), (0, 0), (dil, Hpp - H - dil), (0, 0)))
    x_pad = x_pad.reshape(B, Cin, Hpp * W).astype(jnp.bfloat16)

    # ---- horizontal border masks (vertical borders are real zero rows) ----
    col = jnp.tile(jnp.arange(W), TH)
    masks = jnp.stack([(col >= dil), (col < W - dil)]).astype(jnp.float32)

    kernel = functools.partial(_aspp_kernel, W=W, dil=dil, cout=Cout, th=TH)

    def const(arr):
        return pl.BlockSpec(arr.shape, lambda b, r: (0,) * arr.ndim)

    out = pl.pallas_call(
        kernel,
        out_shape=jax.ShapeDtypeStruct((B, Cout, H * W), jnp.float32),
        grid_spec=pltpu.PrefetchScalarGridSpec(
            num_scalar_prefetch=0,
            grid=(B, R),
            in_specs=[
                pl.BlockSpec((1, Cin, THW), lambda b, r: (b, 0, r)),      # cur
                pl.BlockSpec((1, Cin, THW), lambda b, r: (b, 0, r + 1)),  # halo
                const(wmain), const(wc_a), const(wc_b), const(masks),
                const(b13),
                pl.BlockSpec((1, Cout, 1), lambda b, r: (b, 0, 0)),       # beff
            ],
            out_specs=pl.BlockSpec((1, Cout, THW), lambda b, r: (b, 0, r)),
        ),
        compiler_params=pltpu.CompilerParams(
            # Both axes are reduction-free -> shardable across v7x's 2 TCs.
            dimension_semantics=("parallel", "parallel"),
            # 48 MiB: safe headroom under v7x's 64 MiB physical VMEM; raise to
            # ~96 MiB on v6e/v5e when using taller row blocks at prod sizes.
            vmem_limit_bytes=48 * 1024 * 1024),
    )(x_pad, x_pad, wmain, wc_a, wc_b, masks, b13, bias_eff)
    return out.reshape(B, Cout, H, W)


# ---------------------------------------------------------------------------
# Parameter construction / BN folding / pure-JAX reference
# ---------------------------------------------------------------------------
# TODO(synk): training-mode BatchNorm (batch statistics + running-stat updates)
# is not implemented; eval-mode BN with its default state is folded below.
def fold_bn(w, b, eps=1e-5):
    """Fold an eval-mode BatchNorm with default state (gamma=1, beta=0,
    mean=0, var=1) into a conv's (weight, bias)."""
    scale = 1.0 / jnp.sqrt(1.0 + eps)
    return w * scale, b * scale


def make_params(key, dim_in, dim_out):
    ks = jax.random.split(key, 8)
    s = 0.1
    # PyTorch-style layouts: 1x1 convs (Cout, Cin), 3x3 conv (Cout, Cin, 3, 3)
    w1 = jax.random.normal(ks[0], (dim_out, dim_in), jnp.float32) * s
    b1 = jax.random.normal(ks[1], (dim_out,), jnp.float32) * s
    w3 = jax.random.normal(ks[2], (dim_out, dim_in, 3, 3), jnp.float32) * s
    b3 = jax.random.normal(ks[3], (dim_out,), jnp.float32) * s
    w5 = jax.random.normal(ks[4], (dim_out, dim_in), jnp.float32) * s
    b5 = jax.random.normal(ks[5], (dim_out,), jnp.float32) * s
    wcat = jax.random.normal(ks[6], (dim_out, 3 * dim_out), jnp.float32) * s
    bcat = jax.random.normal(ks[7], (dim_out,), jnp.float32) * s

    w1, b1 = fold_bn(w1, b1)
    w3, b3 = fold_bn(w3, b3)
    w5, b5 = fold_bn(w5, b5)
    wcat, bcat = fold_bn(wcat, bcat)
    return (w1, b1, w3, b3, w5, b5, wcat, bcat)


def ref_forward(x, params, *, dil):
    """Pure-JAX NCHW reference mirroring the PyTorch forward (BN pre-folded)."""
    w1, b1, w3, b3, w5, b5, wcat, bcat = params
    B, Ci, H, W = x.shape
    Co = w1.shape[0]
    hp = jax.lax.Precision.HIGHEST
    c1 = jax.nn.relu(jnp.einsum('oc,bchw->bohw', w1, x, precision=hp)
                     + b1[None, :, None, None])
    c3 = jax.lax.conv_general_dilated(
        x, w3, window_strides=(1, 1), padding=[(dil, dil), (dil, dil)],
        rhs_dilation=(dil, dil), dimension_numbers=('NCHW', 'OIHW', 'NCHW'),
        precision=hp)
    c3 = jax.nn.relu(c3 + b3[None, :, None, None])
    g = jnp.mean(x, axis=(2, 3))                                    # (B, Ci)
    g = jax.nn.relu(jnp.einsum('oc,bc->bo', w5, g, precision=hp) + b5)
    gb = jnp.broadcast_to(g[:, :, None, None], (B, Co, H, W))       # bilinear 1x1 -> const
    cat = jnp.concatenate([c1, c3, gb], axis=1)
    return jax.nn.relu(jnp.einsum('oc,bchw->bohw', wcat, cat, precision=hp)
                       + bcat[None, :, None, None])


if __name__ == "__main__":
    B, C_in, H, W = 2, 4, 16, 16
    dim_out = 8
    rate = 1
    dil = 2 * rate

    key = jax.random.PRNGKey(0)
    kx, kp = jax.random.split(key)
    x = jax.random.normal(kx, (B, C_in, H, W), jnp.float32)     # NCHW, like PyTorch
    params = make_params(kp, C_in, dim_out)

    # row_block=8 -> two row blocks per image, so the halo path is exercised.
    out = aspp_pallas(x, params, dil=dil, row_block=8)
    jax.block_until_ready(out)

    ref = ref_forward(x, params, dil=dil)
    assert out.shape == (B, dim_out, H, W)
    # bf16 MXU operands with f32 accumulation -> loosened tolerance.
    assert jnp.allclose(out, ref, atol=3e-2, rtol=3e-2), "mismatch vs reference"

    print("KERNEL_OK")
</pallas_src>

<mosaic_0001>
module attributes {stable_mosaic.version = 11 : i64} {
  func.func @_aspp_kernel(%arg0: i32, %arg1: i32, %arg2: memref<1x4x128xbf16, #tpu.memory_space<vmem>>, %arg3: memref<1x4x128xbf16, #tpu.memory_space<vmem>>, %arg4: memref<80x4xbf16, #tpu.memory_space<vmem>>, %arg5: memref<8x8xbf16, #tpu.memory_space<vmem>>, %arg6: memref<8x8xbf16, #tpu.memory_space<vmem>>, %arg7: memref<2x128xf32, #tpu.memory_space<vmem>>, %arg8: memref<8x2xf32, #tpu.memory_space<vmem>>, %arg9: memref<1x8x1xf32, #tpu.memory_space<vmem>>, %arg10: memref<1x8x128xf32, #tpu.memory_space<vmem>>) attributes {dimension_semantics = [#tpu.dimension_semantics<parallel>, #tpu.dimension_semantics<parallel>], iteration_bounds = array<i64: 2, 2>, scalar_prefetch = 0 : i64, scratch_operands = 0 : i64, tpu.core_type = #tpu.core_type<tc>, window_params = [{transform_indices = @transform_0, window_bounds = array<i64: 1, 4, 128>}, {transform_indices = @transform_1, window_bounds = array<i64: 1, 4, 128>}, {pipeline_mode = #tpu.pipeline_mode<synchronous>, transform_indices = @transform_2, window_bounds = array<i64: 80, 4>}, {pipeline_mode = #tpu.pipeline_mode<synchronous>, transform_indices = @transform_3, window_bounds = array<i64: 8, 8>}, {pipeline_mode = #tpu.pipeline_mode<synchronous>, transform_indices = @transform_4, window_bounds = array<i64: 8, 8>}, {pipeline_mode = #tpu.pipeline_mode<synchronous>, transform_indices = @transform_5, window_bounds = array<i64: 2, 128>}, {pipeline_mode = #tpu.pipeline_mode<synchronous>, transform_indices = @transform_6, window_bounds = array<i64: 8, 2>}, {transform_indices = @transform_7, window_bounds = array<i64: 1, 8, 1>}, {transform_indices = @transform_8, window_bounds = array<i64: 1, 8, 128>}]} {
    %c0 = arith.constant 0 : index
    %c0_0 = arith.constant 0 : index
    %c0_1 = arith.constant 0 : index
    %0 = vector.load %arg2[%c0, %c0_0, %c0_1] : memref<1x4x128xbf16, #tpu.memory_space<vmem>>, vector<1x4x128xbf16>
    %1 = vector.shape_cast %0 : vector<1x4x128xbf16> to vector<4x128xbf16>
    %c0_2 = arith.constant 0 : index
    %c0_3 = arith.constant 0 : index
    %c0_4 = arith.constant 0 : index
    %2 = vector.load %arg3[%c0_2, %c0_3, %c0_4] : memref<1x4x128xbf16, #tpu.memory_space<vmem>>, vector<1x4x128xbf16>
    %3 = vector.shape_cast %2 : vector<1x4x128xbf16> to vector<4x128xbf16>
    %4 = vector.extract_strided_slice %3 {offsets = [0, 0], sizes = [4, 64], strides = [1, 1]} : vector<4x128xbf16> to vector<4x64xbf16>
    %5 = tpu.concatenate %1, %4 in 1 : vector<4x128xbf16>, vector<4x64xbf16> -> vector<4x192xbf16>
    %c0_5 = arith.constant 0 : index
    %c0_6 = arith.constant 0 : index
    %6 = vector.load %arg4[%c0_5, %c0_6] : memref<80x4xbf16, #tpu.memory_space<vmem>>, vector<80x4xbf16>
    %cst = arith.constant dense<0.000000e+00> : vector<80x192xf32>
    %7 = tpu.matmul %6, %5, %cst {dimension_numbers = #tpu.dot_dimension_numbers<[1], [0], [0], [1], [0, 0, 1, 1], [], []>} : vector<80x4xbf16>, vector<4x192xbf16>, vector<80x192xf32> -> vector<80x192xf32>
    %8 = vector.extract_strided_slice %7 {offsets = [0, 32], sizes = [8, 128], strides = [1, 1]} : vector<80x192xf32> to vector<8x128xf32>
    %c0_7 = arith.constant 0 : index
    %c0_8 = arith.constant 0 : index
    %9 = vector.load %arg8[%c0_7, %c0_8] : memref<8x2xf32, #tpu.memory_space<vmem>>, vector<8x1xf32>
    %10 = vector.broadcast %9 : vector<8x1xf32> to vector<8x128xf32>
    %11 = arith.addf %8, %10 : vector<8x128xf32>
    %cst_9 = arith.constant 0.000000e+00 : f32
    %12 = vector.broadcast %cst_9 : f32 to vector<8x128xf32>
    %13 = arith.maximumf %11, %12 : vector<8x128xf32>
    %14 = vector.extract_strided_slice %7 {offsets = [8, 0], sizes = [8, 192], strides = [1, 1]} : vector<80x192xf32> to vector<8x192xf32>
    %15 = vector.extract_strided_slice %14 {offsets = [0, 0], sizes = [8, 128], strides = [1, 1]} : vector<8x192xf32> to vector<8x128xf32>
    %c2_i32 = arith.constant 2 : i32
    %16 = tpu.dynamic_rotate %15 by %c2_i32 dim 1 : vector<8x128xf32>, i32 -> vector<8x128xf32>
    %17 = vector.extract_strided_slice %7 {offsets = [32, 0], sizes = [8, 192], strides = [1, 1]} : vector<80x192xf32> to vector<8x192xf32>
    %18 = vector.extract_strided_slice %17 {offsets = [0, 30], sizes = [8, 128], strides = [1, 1]} : vector<8x192xf32> to vector<8x128xf32>
    %19 = arith.addf %16, %18 : vector<8x128xf32>
    %20 = vector.extract_strided_slice %7 {offsets = [56, 0], sizes = [8, 192], strides = [1, 1]} : vector<80x192xf32> to vector<8x192xf32>
    %21 = vector.extract_strided_slice %20 {offsets = [0, 62], sizes = [8, 128], strides = [1, 1]} : vector<8x192xf32> to vector<8x128xf32>
    %22 = arith.addf %19, %21 : vector<8x128xf32>
    %23 = vector.extract_strided_slice %7 {offsets = [16, 0], sizes = [8, 192], strides = [1, 1]} : vector<80x192xf32> to vector<8x192xf32>
    %24 = vector.extract_strided_slice %23 {offsets = [0, 0], sizes = [8, 128], strides = [1, 1]} : vector<8x192xf32> to vector<8x128xf32>
    %25 = vector.extract_strided_slice %7 {offsets = [40, 0], sizes = [8, 192], strides = [1, 1]} : vector<80x192xf32> to vector<8x192xf32>
    %26 = vector.extract_strided_slice %25 {offsets = [0, 32], sizes = [8, 128], strides = [1, 1]} : vector<8x192xf32> to vector<8x128xf32>
    %27 = arith.addf %24, %26 : vector<8x128xf32>
    %28 = vector.extract_strided_slice %7 {offsets = [64, 0], sizes = [8, 192], strides = [1, 1]} : vector<80x192xf32> to vector<8x192xf32>
    %29 = vector.extract_strided_slice %28 {offsets = [0, 64], sizes = [8, 128], strides = [1, 1]} : vector<8x192xf32> to vector<8x128xf32>
    %30 = arith.addf %27, %29 : vector<8x128xf32>
    %31 = vector.extract_strided_slice %7 {offsets = [24, 0], sizes = [8, 192], strides = [1, 1]} : vector<80x192xf32> to vector<8x192xf32>
    %32 = vector.extract_strided_slice %31 {offsets = [0, 2], sizes = [8, 128], strides = [1, 1]} : vector<8x192xf32> to vector<8x128xf32>
    %33 = vector.extract_strided_slice %7 {offsets = [48, 0], sizes = [8, 192], strides = [1, 1]} : vector<80x192xf32> to vector<8x192xf32>
    %34 = vector.extract_strided_slice %33 {offsets = [0, 34], sizes = [8, 128], strides = [1, 1]} : vector<8x192xf32> to vector<8x128xf32>
    %35 = arith.addf %32, %34 : vector<8x128xf32>
    %36 = vector.extract_strided_slice %7 {offsets = [72, 0], sizes = [8, 192], strides = [1, 1]} : vector<80x192xf32> to vector<8x192xf32>
    %37 = vector.extract_strided_slice %36 {offsets = [0, 64], sizes = [8, 128], strides = [1, 1]} : vector<8x192xf32> to vector<8x128xf32>
    %c126_i32 = arith.constant 126 : i32
    %38 = tpu.dynamic_rotate %37 by %c126_i32 dim 1 : vector<8x128xf32>, i32 -> vector<8x128xf32>
    %39 = arith.addf %35, %38 : vector<8x128xf32>
    %c0_10 = arith.constant 0 : index
    %c0_11 = arith.constant 0 : index
    %40 = vector.load %arg7[%c0_10, %c0_11] : memref<2x128xf32, #tpu.memory_space<vmem>>, vector<1x128xf32>
    %41 = vector.broadcast %40 : vector<1x128xf32> to vector<8x128xf32>
    %42 = arith.mulf %22, %41 : vector<8x128xf32>
    %43 = arith.addf %42, %30 : vector<8x128xf32>
    %c1 = arith.constant 1 : index
    %c0_12 = arith.constant 0 : index
    %44 = vector.load %arg7[%c1, %c0_12] : memref<2x128xf32, #tpu.memory_space<vmem>>, vector<1x128xf32>
    %45 = vector.broadcast %44 : vector<1x128xf32> to vector<8x128xf32>
    %46 = arith.mulf %39, %45 : vector<8x128xf32>
    %47 = arith.addf %43, %46 : vector<8x128xf32>
    %c0_13 = arith.constant 0 : index
    %c1_14 = arith.constant 1 : index
    %48 = vector.load %arg8[%c0_13, %c1_14] : memref<8x2xf32, #tpu.memory_space<vmem>>, vector<8x1xf32>
    %49 = vector.broadcast %48 : vector<8x1xf32> to vector<8x128xf32>
    %50 = arith.addf %47, %49 : vector<8x128xf32>
    %cst_15 = arith.constant 0.000000e+00 : f32
    %51 = vector.broadcast %cst_15 : f32 to vector<8x128xf32>
    %52 = arith.maximumf %50, %51 : vector<8x128xf32>
    %c0_16 = arith.constant 0 : index
    %c0_17 = arith.constant 0 : index
    %53 = vector.load %arg5[%c0_16, %c0_17] : memref<8x8xbf16, #tpu.memory_space<vmem>>, vector<8x8xbf16>
    %54 = arith.truncf %13 : vector<8x128xf32> to vector<8x128xbf16>
    %cst_18 = arith.constant dense<0.000000e+00> : vector<8x128xf32>
    %55 = tpu.matmul %53, %54, %cst_18 {dimension_numbers = #tpu.dot_dimension_numbers<[1], [0], [0], [1], [0, 0, 1, 1], [], []>} : vector<8x8xbf16>, vector<8x128xbf16>, vector<8x128xf32> -> vector<8x128xf32>
    %c0_19 = arith.constant 0 : index
    %c0_20 = arith.constant 0 : index
    %56 = vector.load %arg6[%c0_19, %c0_20] : memref<8x8xbf16, #tpu.memory_space<vmem>>, vector<8x8xbf16>
    %57 = arith.truncf %52 : vector<8x128xf32> to vector<8x128xbf16>
    %cst_21 = arith.constant dense<0.000000e+00> : vector<8x128xf32>
    %58 = tpu.matmul %56, %57, %cst_21 {dimension_numbers = #tpu.dot_dimension_numbers<[1], [0], [0], [1], [0, 0, 1, 1], [], []>} : vector<8x8xbf16>, vector<8x128xbf16>, vector<8x128xf32> -> vector<8x128xf32>
    %59 = arith.addf %55, %58 : vector<8x128xf32>
    %c0_22 = arith.constant 0 : index
    %c0_23 = arith.constant 0 : index
    %c0_24 = arith.constant 0 : index
    %60 = vector.load %arg9[%c0_22, %c0_23, %c0_24] : memref<1x8x1xf32, #tpu.memory_space<vmem>>, vector<1x8x1xf32>
    %61 = vector.shape_cast %60 : vector<1x8x1xf32> to vector<8x1xf32>
    %62 = vector.broadcast %61 : vector<8x1xf32> to vector<8x128xf32>
    %63 = arith.addf %59, %62 : vector<8x128xf32>
    %cst_25 = arith.constant 0.000000e+00 : f32
    %64 = vector.broadcast %cst_25 : f32 to vector<8x128xf32>
    %65 = arith.maximumf %63, %64 : vector<8x128xf32>
    %c0_26 = arith.constant 0 : index
    %c0_27 = arith.constant 0 : index
    %c0_28 = arith.constant 0 : index
    %66 = vector.load %arg10[%c0_26, %c0_27, %c0_28] : memref<1x8x128xf32, #tpu.memory_space<vmem>>, vector<1x8x128xf32>
    %67 = vector.shape_cast %66 : vector<1x8x128xf32> to vector<8x128xf32>
    %68 = vector.shape_cast %65 : vector<8x128xf32> to vector<1x8x128xf32>
    tpu.vector_store %arg10[%c0_26, %c0_27, %c0_28], %68 {strides = array<i32>} : memref<1x8x128xf32, #tpu.memory_space<vmem>>, vector<1x8x128xf32>,
    return
  }
  func.func @transform_0(%arg0: i32, %arg1: i32) -> (i32, i32, i32) {
    %c0_i32 = arith.constant 0 : i32
    %c0_i32_0 = arith.constant 0 : i32
    return %arg0, %c0_i32, %arg1 : i32, i32, i32
  }
  func.func @transform_1(%arg0: i32, %arg1: i32) -> (i32, i32, i32) {
    %c1_i32 = arith.constant 1 : i32
    %0 = arith.addi %arg1, %c1_i32 : i32
    %c0_i32 = arith.constant 0 : i32
    %c0_i32_0 = arith.constant 0 : i32
    return %arg0, %c0_i32, %0 : i32, i32, i32
  }
  func.func @transform_2(%arg0: i32, %arg1: i32) -> (i32, i32) {
    %c0_i32 = arith.constant 0 : i32
    %c0_i32_0 = arith.constant 0 : i32
    %c0_i32_1 = arith.constant 0 : i32
    return %c0_i32, %c0_i32_0 : i32, i32
  }
  func.func @transform_3(%arg0: i32, %arg1: i32) -> (i32, i32) {
    %c0_i32 = arith.constant 0 : i32
    %c0_i32_0 = arith.constant 0 : i32
    %c0_i32_1 = arith.constant 0 : i32
    return %c0_i32, %c0_i32_0 : i32, i32
  }
  func.func @transform_4(%arg0: i32, %arg1: i32) -> (i32, i32) {
    %c0_i32 = arith.constant 0 : i32
    %c0_i32_0 = arith.constant 0 : i32
    %c0_i32_1 = arith.constant 0 : i32
    return %c0_i32, %c0_i32_0 : i32, i32
  }
  func.func @transform_5(%arg0: i32, %arg1: i32) -> (i32, i32) {
    %c0_i32 = arith.constant 0 : i32
    %c0_i32_0 = arith.constant 0 : i32
    %c0_i32_1 = arith.constant 0 : i32
    return %c0_i32, %c0_i32_0 : i32, i32
  }
  func.func @transform_6(%arg0: i32, %arg1: i32) -> (i32, i32) {
    %c0_i32 = arith.constant 0 : i32
    %c0_i32_0 = arith.constant 0 : i32
    %c0_i32_1 = arith.constant 0 : i32
    return %c0_i32, %c0_i32_0 : i32, i32
  }
  func.func @transform_7(%arg0: i32, %arg1: i32) -> (i32, i32, i32) {
    %c0_i32 = arith.constant 0 : i32
    %c0_i32_0 = arith.constant 0 : i32
    %c0_i32_1 = arith.constant 0 : i32
    return %arg0, %c0_i32, %c0_i32_0 : i32, i32, i32
  }
  func.func @transform_8(%arg0: i32, %arg1: i32) -> (i32, i32, i32) {
    %c0_i32 = arith.constant 0 : i32
    %c0_i32_0 = arith.constant 0 : i32
    return %arg0, %c0_i32, %arg1 : i32, i32, i32
  }
}

</mosaic_0001>

<bundles_post_ra>
// kernel: tpu_custom_call.1
= control target key start
LH: loop header
LB: loop body
LE: loop exit
PB: predicated region body
PF: predicated region fallthrough
CT: control target
= control target key end

     0   :  { %13 = vsyncpa [#allocation3], 0  ;;  %s1379_s0 = inlined_call_operand.vmem [shape: bf16[2,4,384], index: 0, kind: input, shape index: {}]   ;;  %s1380_s1 = inlined_call_operand.vmem [shape: bf16[2,4,384], index: 1, kind: input, shape index: {}]   ;;  %s1381_s2 = inlined_call_operand.vmem [shape: bf16[80,4], index: 2, kind: input, shape index: {}]   ;;  %s1382_s3 = inlined_call_operand.vmem [shape: bf16[8,8], index: 3, kind: input, shape index: {}]   ;;  %s1383_s4 = inlined_call_operand.vmem [shape: bf16[8,8], index: 4, kind: input, shape index: {}]   ;;  %s1384_s5 = inlined_call_operand.vmem [shape: f32[2,128], index: 5, kind: input, shape index: {}]   ;;  %s1385_s6 = inlined_call_operand.vmem [shape: f32[8,2], index: 6, kind: input, shape index: {}]   ;;  %s1386_s7 = inlined_call_operand.vmem [shape: f32[2,8,1], index: 7, kind: input, shape index: {}]   ;;  %s1387_s8 = inlined_call_operand.hbm [shape: f32[2,8,256], index: 8, kind: output, shape index: {}]  }
   0x1   :  { %15 = vsyncpa [#allocation3 + $0x1], 0  ;;  %s1168_s27 = smov 0   ;;  %s1170_s28 = smov 0  }
   0x2   :  { %s1172_s29 = smov 0   ;;  %s1174_s30 = smov 0  }
   0x3   :  { %s1176_s9 = smov 0   ;;  %s1178_s10 = smov 0  }
   0x4   :  { %s1180_s11 = smov 0   ;;  %s1182_s12 = smov 0  }
   0x5 LB: > { %1394 = sst [smem:[#allocation5_spill]] %s1090_s29  ;;  %s879_s13 = sadd.s32 4294967295, %s1110_s12   ;;  %s1110_s12 = sphi %s1182_s12, %s21_s12   ;;  %s1106_s11 = sphi %s1180_s11, %s1409_s11   ;;  %s1102_s10 = sphi %s1178_s10, %s1408_s10   ;;  %s1098_s9 = sphi %s1176_s9, %s1407_s9   ;;  %s1094_s30 = sphi %s1174_s30, %s1406_s30   ;;  %s1090_s29 = sphi %s1172_s29, %s1405_s29   ;;  %s1086_s28 = sphi %s1170_s28, %s1411_s28   ;;  %s1082_s27 = sphi %s1168_s27, %s1410_s27  }
   0x6   : > { %1395 = sst [smem:[#allocation6_spill]] %s1102_s10  ;;  %s880_s14 = sadd.s32 4294967294, %s1110_s12  }
   0x7   : > { %1396 = sst [smem:[#allocation7_spill]] %s1106_s11  ;;  %s30_s15 = sadd.s32 1, %s1102_s10 }
   0x8   : > { %p31_p0 = scmp.ge.s32.totalorder %s30_s15, 2  ;;  %s33_s16 = sadd.s32 1, %s1106_s11 }
   0x9   : > { %p241_p1 = scmp.ne.s32.totalorder %s1090_s29, %s1086_s28  ;;  %p242_p2 = scmp.eq.s32.totalorder %s879_s13, 3 }
   0xa   : > { %s1413_s15 = smov (%p31_p0, %s30_s15), 0  ;;  %s1415_s16 = smov (!%p31_p0, %s33_s16), %s1106_s11 }
   0xb   : > { %1397 = sst [smem:[#allocation8_spill]] %s1413_s15  ;;  %s227_s17 = ssub.s32 %s1102_s10, %s1413_s15 }
   0xc   : > { %p1219_p3 = por %p242_p2, %p241_p1  ;;  %p35_p4 = scmp.ge.s32.totalorder %s1415_s16, 2 }
   0xd   : > { %p247_p5 = scmp.ne.s32.totalorder %s1086_s28, %s1082_s27  ;;  %p248_p6 = scmp.eq.s32.totalorder %s880_s14, 3 }
   0xe   : > { %p883_p7 = scmp.ge.s32.totalorder %s1110_s12, 1  ;;  %s1417_s16 = smov (%p35_p4, %s1415_s16), 0 }
   0xf   : > { %1399 = sst [smem:[#allocation9_spill]] %s1417_s16  ;;  %p1228_p8 = por %p248_p6, %p247_p5 }
  0x10   : > { %p312_p9 = scmp.lt.s32.totalorder %s1110_s12, 5  ;;  %s226_s20 = ssub.s32 %s1106_s11, %s1417_s16 }
  0x11   : > { %s1400_s19 = scalar_select %p1228_p8, 1, 0 }
  0x12   : > { %s231_s21 = sadd.s32 1, %s1090_s29  ;;  %s228_s22 = sor.u32 %s227_s17, %s226_s20 }
  0x13   : > { %1401 = sst [smem:[#allocation10_spill]] %s1400_s19  ;;  %p313_p10 = pnand %p883_p7, %p312_p9 }
  0x14   : > { %p229_p11 = scmp.eq.s32.totalorder %s228_s22, 0  ;;  %p362_p12 = scmp.lt.s32.totalorder (!%p313_p10), %s1098_s9, 1  ;;  %v1112_v0 = vmov (!%p313_p10), 0   ;;  %vm438_vm0 = vcmask (!%p313_p10), 1041408   ;;  %v1011_v4 = vld [vmem:[%s1381_s2] sm:$0xff] (!%p313_p10)   ;;  %vm422_vm1 = vcmask (!%p313_p10), 31744  }
  0x15   : > { %316 = sbr.rel (%p313_p10) target bundleno = 980 (0x3d4), region = 52  ;;  %s370_s24 = sadd.s32 (!%p313_p10), 1, %s1094_s30  ;;  %477 = vmatprep.mubr.bf16.mxu0 (!%p313_p10), %v1112_v0  ;;  %515 = vmatprep.mubr.bf16.mxu1 (!%p313_p10), %v1112_v0  ;;  %v1012_v5 = vld [vmem:[%s1381_s2 + $0x20] sm:$0xff] (!%p313_p10)   ;;  %v1013_v6 = vld [vmem:[%s1381_s2 + $0x8] sm:$0xff] (!%p313_p10)   ;;  %v1014_v7 = vld [vmem:[%s1381_s2 + $0x10] sm:$0xff] (!%p313_p10)   ;;  %vm574_vm2 = vcmask (!%p313_p10), 523264  }
  0x16   : > { %s1237_s23 = scalar_select %p229_p11, %s1090_s29, %s231_s21  }
  0x17   : > { %p373_p13 = scmp.lt.s32.totalorder (!%p313_p10), %s370_s24, 2  ;;  %p364_p0 = scmp.lt.s32.totalorder (!%p313_p10), %s1094_s30, 2  ;;  %1008 = vset.pattern.permute.xlu1 (!%p313_p10), %v1112_v0  ;;  %1010 = vset.pattern.permute.xlu0 (!%p313_p10), %v1112_v0  ;;  %v1015_v8 = vld [vmem:[%s1381_s2 + $0x18] sm:$0xff] (!%p313_p10)   ;;  %v900_v28 = vld [vmem:[%s1384_s5 + $0x1] ss:$0 sm:$0xff] (!%p313_p10)  ;;  %v1119_v35 = vmov (!%p313_p10), 1  }
  0x18   : > { %1402 = sst [smem:[#allocation11_spill]] %s1237_s23  ;;  %s1116_s21 = smov (!%p313_p10), 98   ;;  %v526_v34 = vld [vmem:[%s1385_s6] sm:$0xff] (!%p313_p10)  ;;  %vm564_vm3 = vcmask (!%p313_p10), 785408   ;;  %v1120_v39 = vmov (!%p313_p10), 0.0   ;;  %vm1121_vm4 = vmmov (!%p313_p10), 0  }
  0x19   : > { %s1117_s22 = smov (!%p313_p10), 66   ;;  %vm544_vm5 = vcmask (!%p313_p10), 801792   ;;  %vm554_vm6 = vcmask (!%p313_p10), 539648   ;;  %vm629_vm7 = vcmask (!%p313_p10), 1031168   ;;  %vm648_vm8 = vcmask (!%p313_p10), 1043456  }
  0x1a   : > { %vm644_vm9 = vcmask (!%p313_p10), 64512  }
  0x1c   : > { %s1243_s25 = scalar_select %p362_p12, %s1098_s9, 1 }
  0x1d   : > { %s1419_s24 = smov (!%p373_p13, %s370_s24), 2 }
  0x1e   : > { %s926_s26 = smul.u32 3, %s1243_s25  ;;  %s887_s11 = sshll.u32 %s1243_s25, 3 }
  0x1f   : > { %s365_s13 = scalar_select %p364_p0, %s1094_s30, 2 }
  0x20   : > { %s376_s14 = sadd.s32 %s926_s26, %s1419_s24  ;;  %s1118_s24 = smov 126  }
  0x21   : > { %s886_s17 = sshll.u32 %s376_s14, 1  ;;  %s367_s20 = sadd.s32 %s926_s26, %s365_s13 }
  0x22   : > { %s378_s16 = scalar_lea.vmem %s1380_s1, %s886_s17  ;;  %s885_s15 = sshll.u32 %s367_s20, 1 }
  0x23   : > { %v386_v1 = vld [vmem:[%s378_s16] sm:$0x3]  ;;  %s369_s23 = scalar_lea.vmem %s1379_s0, %s885_s15  ;;  %s1114_s13 = smov 96  }
  0x24   : > { %893 = vmatprep.subr.msk.bf16.mxu0 %vm438_vm0, %v386_v1  ;;  %924 = vmatprep.subr.msk.bf16.mxu1 %vm438_vm0, %v386_v1  ;;  %v385_v2 = vld [vmem:[%s369_s23] sm:$0x3]  ;;  %s1113_s23 = smov 64   ;;  %s1115_s20 = smov 2  }
  0x25   : > { %v440_v3 = vsel %vm438_vm0, %v385_v2, 0  ;;  %s383_s29 = scalar_lea.vmem %s1386_s7, %s887_s11  ;;  %s1122_s25 = smov [#allocation2]  }
  0x26   : > { %446 = vmatpush1.bf16.msra.mxu0 %v440_v3  ;;  %925 = vmatpush1.bf16.msra.mxu1 %v440_v3  ;;  %v746_v55 = vld [vmem:[%s383_s29] sm:$0xff]  ;;  %s1020_s19 = sshll.u32 %s1122_s25, 4  ;;  %s1021_s19 = int_to_ptr.vmem [resolvable:$false] %s1020_s19 }
  0x27   : > { %912 = vmatprep.subr.bf16.mxu1 %v1120_v39 }
  0x29   : > { %894 = vmatmul.mubr.msk.bf16.vlgmr.msra.gmra.mrb[0].mxu0 %vm422_vm1, %v1011_v4  ;;  %898 = vmatmul.mubr.msk.bf16.vlgmr.msra.gmra.mrb[0].mxu1 %vm422_vm1, %v1012_v5 }
  0x2a   : > { %486 = vmatprep.mubr.bf16.mxu0 %v1112_v0  ;;  %914 = vmatprep.mubr.msk.bf16.mxu1 %vm1121_vm4, %v1120_v39 }
  0x31   : > { %895 = vmatmul.mubr.msk.bf16.gmra.mrb[4].mxu0 %vm422_vm1, %v1013_v6 }
  0x32   : > { %495 = vmatprep.mubr.bf16.mxu0 %v1112_v0 }
  0x39   : > { %896 = vmatmul.mubr.msk.bf16.gmra.mrb[8].mxu0 %vm422_vm1, %v1014_v7 }
  0x3a   : > { %505 = vmatprep.mubr.bf16.mxu0 %v1112_v0 }
  0x41   : > { %897 = vmatmul.mubr.msk.bf16.gmra.mrb[12].mxu0 %vm422_vm1, %v1015_v8 }
  0xfc   : > { %v517_v9 = vpop.f32.mrb[0].mxu1  ;;  %v1268_v10 = vpop.f32.mrb[0].mxu0 }
  0xfd   : > { %v519_v11 = vpop.f32.mrb[1].mxu1  ;;  %v1270_v12 = vpop.f32.mrb[1].mxu0 }
  0xfe   : > { %v521_v13 = vpop.f32.mrb[2].mxu1  ;;  %v483_v14 = vpop.f32.mrb[2].mxu0 }
  0xff   : > { %591 = vrot.lane.b32.xlu0 %v521_v13, %s1113_s23  ;;  %v523_v15 = vpop.f32.mrb[3].mxu1  ;;  %v485_v16 = vpop.f32.mrb[3].mxu0 }
 0x103   : > { %593 = vrot.lane.b32.xlu0 %v523_v15, %s1113_s23 }
 0x104   : > { %v1274_v17 = vpop.f32.mrb[4].mxu0 }
 0x105   : > { %v490_v18 = vpop.f32.mrb[5].mxu0 }
 0x106   : > { %v491_v19 = vpop.f32.mrb[6].mxu0 }
 0x107   : > { %v493_v20 = vpop.f32.mrb[7].mxu0 }
 0x10c   : > { %v497_v21 = vpop.f32.mrb[8].mxu0 }
 0x10d   : > { %v499_v22 = vpop.f32.mrb[9].mxu0 }
 0x10e   : > { %v501_v23 = vpop.f32.mrb[10].mxu0 }
 0x10f   : > { %v503_v24 = vpop.f32.mrb[11].mxu0 }
 0x114   : > { %v507_v25 = vpop.f32.mrb[12].mxu0 }
 0x115   : > { %v509_v26 = vpop.f32.mrb[13].mxu0 }
 0x116   : > { %582 = vrot.lane.b32.xlu0 %v509_v26, %s1114_s13  ;;  %v511_v27 = vpop.f32.mrb[14].mxu0  ;;  %v639_v26 = vld [vmem:[%s1382_s3] sm:$0xf] }
 0x117   : > { %v513_v29 = vpop.f32.mrb[15].mxu0 }
 0x11a   : > { %618 = vrot.lane.b32.xlu0 %v900_v28, %s1115_s20 }
 0x11e   : > { %540 = vrot.lane.b32.xlu0 %v497_v21, %s1116_s21 }
 0x122   : > { %536 = vrot.lane.b32.xlu0 %v483_v14, %s1115_s20 }
 0x126   : > { %552 = vrot.lane.b32.xlu0 %v513_v29, %s1117_s22 }
 0x12a   : > { %562 = vrot.lane.b32.xlu0 %v503_v24, %s1114_s13 }
 0x12e   : > { %572 = vrot.lane.b32.xlu0 %v519_v11, %s1113_s23 }
 0x171   : > { %v592_v30 = vpop.permute.xlu0 %591 }
 0x175   : > { %v594_v31 = vpop.permute.xlu0 %593 }
 0x176   : > { %v595_v32 = vsel %vm574_vm2, %v592_v30, %v594_v31 }
 0x177   : > { %597 = vrot.lane.b32.xlu1 %v595_v32, %s1118_s24 }
 0x17b   : > { %580 = vrot.lane.b32.xlu1 %v507_v25, %s1114_s13 }
 0x188   : > { %v583_v37 = vpop.permute.xlu0 %582 }
 0x189   : > { %v588_v40 = vadd.f32 %v583_v37, %v493_v20 }
 0x18c   : > { %v619_v45 = vpop.permute.xlu0 %618 }
 0x190   : > { %v541_v56 = vpop.permute.xlu0 %540 }
 0x194   : > { %v537_v58 = vpop.permute.xlu0 %536 }
 0x198   : > { %v553_v60 = vpop.permute.xlu0 %552 }
 0x19c   : > { %v563_v62 = vpop.permute.xlu0 %562 }
 0x1a0   : > { %v573_v3 = vpop.permute.xlu0 %572 }
 0x1e9   : > { %v598_v33 = vpop.permute.xlu1 %597 }
 0x1ea   : > { %600 = vrot.lane.b32.xlu1 %v598_v33, %s1115_s20  ;;  %s359_s20 = sand.u32 1, %s1086_s28  }
 0x1ed   : > { %v581_v36 = vpop.permute.xlu1 %580 }
 0x1ee   : > { %529 = vperm.xlu1 %1008, %v526_v34   ;;  %v584_v38 = vsel %vm564_vm3, %v581_v36, %v583_v37 }
 0x1ef   : > { %v587_v41 = vadd.f32 %v584_v38, %v491_v19 }
 0x1f2   : > { %542 = vrot.lane.b32.xlu1 %v499_v22, %s1116_s21  ;;  %s884_s21 = sshll.u32 %s359_s20, 3 }
 0x1f3   : > { %1009 = vset.pattern.permute.xlu1 %v1119_v35  ;;  %s361_s10 = scalar_lea.vmem [#allocation2], %s884_s21 }
 0x1f4   : > { %s771_s11 = sshll.u32 %s361_s10, 4  ;;  %s1328_s11 = int_to_ptr.vmem [resolvable:$true] %s771_s11 }
 0x1f5   : > { %p1023_p5 = scmp.lt.s32.totalorder %s1328_s11, %s1021_s19 }
 0x1f6   : > { %550 = vrot.lane.b32.xlu1 %v511_v27, %s1117_s22  ;;  %s904_s22 = sshll.u32 %s1098_s9, 1  ;;  %s1016_s9 = scalar_lea.vmem %s1328_s11, 128 }
 0x1f7   : > { %p1017_p1 = scmp.ne.s32.totalorder %s1328_s11, %s1016_s9 }
 0x1f9   : > { %p1018_p2 = pnand %p1017_p1, %p1219_p3 }
 0x1fa   : > { %560 = vrot.lane.b32.xlu1 %v501_v23, %s1114_s13 }
 0x1fb   : > { %p1019_p4 = pneg %p1018_p2 }
 0x1fe   : > { %570 = vrot.lane.b32.xlu1 %v517_v9, %s1113_s23  ;;  %v899_v9 = vld [vmem:[%s1384_s5] ss:$0 sm:$0xff]  ;;  %s1022_s23 = scalar_lea.vmem %s1021_s19, 256 }
 0x1ff   : > { %p1024_p6 = scmp.lt.s32.totalorder %s1022_s23, %s1016_s9 }
 0x201   : > { %p1025_p7 = por %p1024_p6, %p1023_p5 }
 0x202   : > { %634 = vperm.xlu1 %1009, %v526_v34  }
 0x203   : > { %p1026_p9 = pnand %p1025_p7, %p1019_p4 }
 0x25c   : > { %v601_v42 = vpop.permute.xlu1 %600 }
 0x25d   : > { %v603_v43 = vadd.f32 %v601_v42, %v587_v41  ;;  %v604_v44 = vadd.f32 %v601_v42, %v588_v40 }
 0x25f   : > { %v621_v46 = vmul.f32 %v619_v45, %v603_v43  ;;  %v622_v47 = vmul.f32 %v619_v45, %v604_v44 }
 0x261   : > { %627 = vrot.lane.b32.xlu1 %v622_v47, %s1118_s24  ;;  %625 = vrot.lane.b32.xlu0 %v621_v46, %s1118_s24  ;;  %s767_s24 = sadd.s32 %s1094_s30, %s904_s22  ;;  %s756_s30 = scalar_lea.sflag [#allocation3], %s359_s20 }
 0x262   : > { %s905_s26 = sshll.u32 %s767_s24, 7 }
 0x263   : > { %s1326_s29 = scalar_lea.hbm %s1387_s8, %s905_s26 }
 0x26d   : > { %v530_v48 = vpop.permute.xlu1 %529 }
 0x26e   : > { %v532_v49 = vadd.f32 %v530_v48, %v1268_v10  ;;  %v533_v50 = vadd.f32 %v530_v48, %v1270_v12 }
 0x270   : > { %v534_v51 = vmax.f32 %v532_v49, 0.0  ;;  %v535_v52 = vmax.f32 %v533_v50, 0.0 }
 0x271   : > { %v543_v57 = vpop.permute.xlu1 %542 }
 0x272   : > { %v640_v53 = vpack.c.bf16 %v534_v51, %v534_v51  ;;  %v641_v54 = vpack.c.bf16 %v535_v52, %v535_v52  ;;  %v545_v63 = vsel %vm544_vm5, %v541_v56, %v543_v57 }
 0x273   : > { %v547_v4 = vadd.f32 %v545_v63, %v537_v58 }
 0x274   : > { %696 = vrot.lane.b32.xlu1 %v641_v54, %s1114_s13  ;;  %694 = vrot.lane.b32.xlu0 %v640_v53, %s1114_s13 }
 0x275   : > { %v551_v59 = vpop.permute.xlu1 %550 }
 0x276   : > { %v555_v1 = vsel %vm554_vm6, %v551_v59, %v553_v60 }
 0x277   : > { %v557_v6 = vadd.f32 %v555_v1, %v547_v4 }
 0x278   : > { %749 = vperm.xlu0 %1010, %v746_v55  }
 0x279   : > { %v561_v61 = vpop.permute.xlu1 %560  ;;  %v610_v11 = vmul.f32 %v899_v9, %v557_v6 }
 0x27a   : > { %v565_v2 = vsel %vm564_vm3, %v561_v61, %v563_v62 }
 0x27b   : > { %v567_v7 = vadd.f32 %v565_v2, %v1274_v17  ;;  %v642_v17 = vld [vmem:[%s1383_s4] sm:$0xf] }
 0x27d   : > { %v571_v0 = vpop.permute.xlu1 %570 }
 0x27e   : > { %v575_v5 = vsel %vm574_vm2, %v571_v0, %v573_v3 }
 0x27f   : > { %v577_v10 = vadd.f32 %v575_v5, %v567_v7 }
 0x281   : > { %v635_v8 = vpop.permute.xlu1 %634  ;;  %v611_v13 = vadd.f32 %v610_v11, %v577_v10 }
 0x2d3   : > { %v628_v12 = vpop.permute.xlu1 %627  ;;  %v626_v14 = vpop.permute.xlu0 %625 }
 0x2d4   : > { %v630_v15 = vsel %vm629_vm7, %v626_v14, %v628_v12 }
 0x2d5   : > { %v632_v16 = vadd.f32 %v630_v15, %v611_v13 }
 0x2d7   : > { %v637_v18 = vadd.f32 %v635_v8, %v632_v16 }
 0x2d9   : > { %v638_v19 = vmax.f32 %v637_v18, 0.0 }
 0x2db   : > { %v643_v20 = vpack.c.bf16 %v638_v19, %v638_v19 }
 0x2dd   : > { %v650_v21 = vsel %vm648_vm8, %v643_v20, 0 }
 0x2de   : > { %913 = vmatpush3.bf16.msra.mxu1 %v650_v21 }
 0x2df   : > { %918 = vmatprep.subr.bf16.mxu1 %v1120_v39 }
 0x2e1   : > { %915 = vmatmul.mubr.msk.bf16.vlgmr.msra.gmra.mrb[4].mxu1 %vm644_vm9, %v642_v17 }
 0x2e2   : > { %920 = vmatprep.mubr.msk.bf16.mxu1 %vm1121_vm4, %v1120_v39 }
 0x2e6   : > { %v697_v22 = vpop.permute.xlu1 %696  ;;  %v695_v23 = vpop.permute.xlu0 %694 }
 0x2e7   : > { %v699_v24 = vsel %vm564_vm3, %v695_v23, %v697_v22 }
 0x2e8   : > { %v704_v25 = vsel %vm648_vm8, %v699_v24, 0 }
 0x2e9   : > { %919 = vmatpush3.bf16.msra.mxu1 %v704_v25 }
 0x2ec   : > { %921 = vmatmul.mubr.msk.bf16.vlgmr.msra.gmra.mrb[8].mxu1 %vm644_vm9, %v639_v26 }
 0x2f7   : > { %v750_v32 = vpop.permute.xlu0 %749 }
 0x3b4   : > { %v686_v27 = vpop.f32.mrb[4].mxu1 }
 0x3b5   : > { %v916_v28 = vpop.f32.mrb[5].mxu1 }
 0x3b6   : > { %v689_v29 = vpop.f32.mrb[6].mxu1 }
 0x3b7   : > { %v917_v30 = vpop.f32.mrb[7].mxu1 }
 0x3bf   : > { %v740_v31 = vpop.f32.mrb[8].mxu1 }
 0x3c0   : > { %v741_v33 = vadd.f32 %v740_v31, %v686_v27  ;;  %v922_v34 = vpop.f32.mrb[9].mxu1 }
 0x3c1   : > { %v743_v35 = vpop.f32.mrb[10].mxu1 }
 0x3c2   : > { %v752_v36 = vadd.f32 %v750_v32, %v741_v33  ;;  %v923_v37 = vpop.f32.mrb[11].mxu1 }
 0x3c4   : > { %v753_v38 = vmax.f32 %v752_v36, 0.0 }
 0x3c6   : > { %754 = vst [vmem:[%s361_s10] sm:$0xff] %v753_v38 }
 0x3c7   : > { %1029 = shalt.err (!%p1026_p9)
}
 0x3c8   : > { %s1030_s13 = scalar_lea.hbm %s1326_s29, 128  ;;  %s1034_s20 = scalar_lea.hbm %s1387_s8, 512 }
 0x3c9   : > { %p1031_p10 = scmp.ne.s32.totalorder %s1326_s29, %s1030_s13  ;;  %p1035_p13 = scmp.lt.u32.totalorder %s1326_s29, %s1387_s8 }
 0x3ca   : > { %p1036_p0 = scmp.lt.u32.totalorder %s1034_s20, %s1030_s13  ;;  %p1038_p2 = scmp.lt.u32.totalorder %s1030_s13, %s1326_s29 }
 0x3cb   : > { %p1032_p11 = pnand %p1031_p10, %p1219_p3 }
 0x3cc   : > { %p1037_p1 = por %p1036_p0, %p1035_p13 }
 0x3cd   : > { %p1033_p12 = pneg %p1032_p11 }
 0x3ce   : > { %p1039_p4 = por %p1038_p2, %p1037_p1 }
 0x3d0   : > { %p1040_p5 = pnand %p1039_p4, %p1033_p12 }
 0x3d2   : > { %1043 = shalt.err (!%p1040_p5)
}
 0x3d3   : > { %927 = dma.vmem_to_hbm [thread:$0]  (%p1219_p3), %s1328_s11, 128, %s1326_s29, %s756_s30  }
 0x3d4 PF: > { %p933_p6 = scmp.ge.s32.totalorder %s1110_s12, 2  ;;  %s783_s26 = sand.u32 1, %s1082_s27  }
 0x3d5   : > { %s784_s10 = scalar_lea.sflag [#allocation3], %s783_s26 }
 0x3d6   : > { %p930_p7 = pnand %p933_p6, %p1228_p8 }
 0x3d8   : > { %1077 = dma.done.wait (!%p930_p7), %s784_s10, 128  }
 0x3d9   : > { %1079 = vsyncadd (!%p930_p7), %s784_s10, 4294967168  ;;  %s21_s12 = sadd.s32 1, %s1110_s12   ;;  %s1404_s15 = sld [smem:[#allocation5_spill]] }
 0x3da   : > { %p18_p9 = scmp.ge.s32.totalorder %s21_s12, 6   ;;  %s1405_s29 = sld [smem:[#allocation11_spill]] }
 0x3db   : > { %s1406_s30 = sld [smem:[#allocation6_spill]]  ;;  %s1407_s9 = sld [smem:[#allocation7_spill]] }
 0x3dc   : > { %s1408_s10 = sld [smem:[#allocation8_spill]]  ;;  %s1409_s11 = sld [smem:[#allocation9_spill]] }
 0x3dd   : > { %s1410_s27 = smov %s1086_s28  ;;  %20 = sbr.rel (!%p18_p9) target bundleno = 5 (0x5), region = 93 }
 0x3df   : > { %s1411_s28 = smov %s1404_s15 }
 0x3e4   :  { %789 = vsyncpa [#allocation3], 1 }
 0x3e5   :  { %791 = vsyncpa [#allocation3 + $0x1], 1 }

</bundles_post_ra>
